<compile_context>
chip_gen: v7x
topology: tpu7x:2x2x1
jax: 0.10.0
libtpu: 0.0.40
codegen_flags: <defaults>
</compile_context>

<pallas_src>
import functools

import jax
import jax.numpy as jnp
import numpy as np
from jax.experimental import pallas as pl
from jax.experimental.pallas import tpu as pltpu


def _build_gather(B, H1, W1, H2, W2):
    """Constant 0/1 matrices encoding reflection-pad(1) + 3x3 stride-2 patch rows.

    G[t, r, s] = 1  iff output row r (= (b, oy, ox)) reads feat0 row s (= (b, sy, sx))
    for kernel tap t = dy*3 + dx.
    """
    def reflect(i, n):
        if i < 0:
            return -i
        if i >= n:
            return 2 * n - 2 - i
        return i

    G = np.zeros((9, B * H2 * W2, B * H1 * W1), np.float32)
    for dy in range(3):
        for dx in range(3):
            t = dy * 3 + dx
            for b in range(B):
                for oy in range(H2):
                    for ox in range(W2):
                        sy = reflect(2 * oy + dy - 1, H1)
                        sx = reflect(2 * ox + dx - 1, W1)
                        r = (b * H2 + oy) * W2 + ox
                        s = (b * H1 + sy) * W1 + sx
                        G[t, r, s] = 1.0
    return jnp.asarray(G)


def convblock_kernel(p0_ref, w0_ref, g_ref, w1_ref,
                     bn1_s_ref, bn1_b_ref, w2_ref, bn2_s_ref, bn2_b_ref,
                     ln_w_ref, ln_b_ref, out_ref, *, num_taps, ln_eps, neg_slope):
    # conv0 as one batch-fused GEMM: (B*H1*W1, 9*Cin) @ (9*Cin, 32)
    feat0 = jnp.dot(p0_ref[...], w0_ref[...], preferred_element_type=jnp.float32)

    # conv1 (reflection-pad + 3x3 stride-2) = sum over taps of (G_t @ feat0) @ W1_t
    acc = None
    for t in range(num_taps):                       # static unrolled loop (9 taps)
        rows = jnp.dot(g_ref[t], feat0, preferred_element_type=jnp.float32)
        contrib = jnp.dot(rows, w1_ref[t], preferred_element_type=jnp.float32)
        acc = contrib if acc is None else acc + contrib

    # BN1 (folded eval-mode affine) + LeakyReLU(0.01)
    h = acc * bn1_s_ref[...] + bn1_b_ref[...]
    h = jnp.maximum(h, neg_slope * h)

    # conv2 (1x1 conv == GEMM) + BN2 + LeakyReLU
    y = jnp.dot(h, w2_ref[...], preferred_element_type=jnp.float32)
    y = y * bn2_s_ref[...] + bn2_b_ref[...]
    y = jnp.maximum(y, neg_slope * y)

    # LayerNorm over channels (lane axis), biased variance like nn.LayerNorm
    mu = jnp.mean(y, axis=-1, keepdims=True)
    var = jnp.mean((y - mu) ** 2, axis=-1, keepdims=True)
    y = (y - mu) * jax.lax.rsqrt(var + ln_eps) * ln_w_ref[...] + ln_b_ref[...]

    out_ref[...] = y.astype(out_ref.dtype)


def convblock_forward(x, params, *, bn_eps=1e-5, ln_eps=1e-5, neg_slope=0.01):
    B, Cin, H, W = x.shape
    C0 = params["conv0_w"].shape[0]      # 32
    Cmid = params["conv1_w"].shape[0]    # 16
    Cout = params["conv2_w"].shape[0]    # output_nc

    # spatial sizes after the two reflection-pad(1) + stride-2 3x3 convs
    H1 = (H - 1) // 2 + 1
    W1 = (W - 1) // 2 + 1
    H2 = (H1 - 1) // 2 + 1
    W2 = (W1 - 1) // 2 + 1

    # ---- wrapper-side layout plumbing (pure data movement, no FLOPs) ----
    x_nhwc = jnp.transpose(x, (0, 2, 3, 1)).astype(jnp.float32)
    xp = jnp.pad(x_nhwc, ((0, 0), (1, 1), (1, 1), (0, 0)), mode="reflect")
    patches = jnp.concatenate(
        [xp[:, dy:dy + 2 * H1:2, dx:dx + 2 * W1:2, :]
         for dy in range(3) for dx in range(3)], axis=-1)         # (B, H1, W1, 9*Cin)
    p0 = patches.reshape(B * H1 * W1, 9 * Cin)

    # ---- weight re-arrangement (OIHW -> GEMM form), BN folded to scale/shift ----
    w0 = jnp.transpose(params["conv0_w"], (2, 3, 1, 0)).reshape(9 * Cin, C0)
    w1 = jnp.transpose(params["conv1_w"], (2, 3, 1, 0)).reshape(9, C0, Cmid)
    w2 = jnp.transpose(params["conv2_w"][:, :, 0, 0], (1, 0))     # (Cmid, Cout)

    bn1_s = params["bn1_w"] / jnp.sqrt(params["bn1_rv"] + bn_eps)
    bn1_b = params["bn1_b"] - params["bn1_rm"] * bn1_s
    bn2_s = params["bn2_w"] / jnp.sqrt(params["bn2_rv"] + bn_eps)
    bn2_b = params["bn2_b"] - params["bn2_rm"] * bn2_s

    gather = _build_gather(B, H1, W1, H2, W2)                     # (9, B*H2*W2, B*H1*W1)

    vmem = pl.BlockSpec(memory_space=pltpu.MemorySpace.VMEM)
    kernel = functools.partial(convblock_kernel, num_taps=9,
                               ln_eps=ln_eps, neg_slope=neg_slope)
    out2d = pl.pallas_call(
        kernel,
        out_shape=jax.ShapeDtypeStruct((B * H2 * W2, Cout), jnp.float32),
        in_specs=[vmem] * 11,
        out_specs=vmem,
    )(p0, w0, gather, w1,
      bn1_s.reshape(1, Cmid), bn1_b.reshape(1, Cmid),
      w2, bn2_s.reshape(1, Cout), bn2_b.reshape(1, Cout),
      params["ln_w"].reshape(1, Cout), params["ln_b"].reshape(1, Cout))

    return out2d.reshape(B, H2 * W2, Cout), H2, W2


def convblock_reference(x, params, *, bn_eps=1e-5, ln_eps=1e-5, neg_slope=0.01):
    """Pure-JAX reference matching the PyTorch module (eval-mode BN)."""
    def rpad(a):
        return jnp.pad(a, ((0, 0), (0, 0), (1, 1), (1, 1)), mode="reflect")

    def conv(a, w, stride):
        return jax.lax.conv_general_dilated(
            a, w, window_strides=(stride, stride), padding="VALID",
            dimension_numbers=("NCHW", "OIHW", "NCHW"))

    def bn(a, g, b, rm, rv):
        s = g / jnp.sqrt(rv + bn_eps)
        return a * s[None, :, None, None] + (b - rm * s)[None, :, None, None]

    def lrelu(a):
        return jnp.maximum(a, neg_slope * a)

    f = conv(rpad(x), params["conv0_w"], 2)                       # conv0
    f = conv(rpad(f), params["conv1_w"], 2)                       # BasicBlock.conv1
    f = lrelu(bn(f, params["bn1_w"], params["bn1_b"], params["bn1_rm"], params["bn1_rv"]))
    f = conv(f, params["conv2_w"], 1)                             # BasicBlock.conv2 (1x1)
    f = lrelu(bn(f, params["bn2_w"], params["bn2_b"], params["bn2_rm"], params["bn2_rv"]))
    B, C, Hh, Ww = f.shape
    t = jnp.transpose(f.reshape(B, C, Hh * Ww), (0, 2, 1))        # (B, H*W, C)
    mu = jnp.mean(t, axis=-1, keepdims=True)
    var = jnp.mean((t - mu) ** 2, axis=-1, keepdims=True)
    t = (t - mu) * jax.lax.rsqrt(var + ln_eps) * params["ln_w"] + params["ln_b"]
    return t, Hh, Ww


if __name__ == "__main__":
    B, Cin, H, W = 2, 4, 16, 16     # ConvBlock(input_nc=4, output_nc=16), 16x16 input
    Cout = 16

    key = jax.random.PRNGKey(0)
    ks = jax.random.split(key, 16)

    params = dict(
        conv0_w=0.1 * jax.random.normal(ks[0], (32, Cin, 3, 3), jnp.float32),
        conv1_w=0.1 * jax.random.normal(ks[1], (16, 32, 3, 3), jnp.float32),
        conv2_w=0.1 * jax.random.normal(ks[2], (Cout, 16, 1, 1), jnp.float32),
        bn1_w=1.0 + 0.1 * jax.random.normal(ks[3], (16,), jnp.float32),
        bn1_b=0.1 * jax.random.normal(ks[4], (16,), jnp.float32),
        bn1_rm=0.1 * jax.random.normal(ks[5], (16,), jnp.float32),
        bn1_rv=jax.random.uniform(ks[6], (16,), jnp.float32, 0.5, 1.5),
        bn2_w=1.0 + 0.1 * jax.random.normal(ks[7], (Cout,), jnp.float32),
        bn2_b=0.1 * jax.random.normal(ks[8], (Cout,), jnp.float32),
        bn2_rm=0.1 * jax.random.normal(ks[9], (Cout,), jnp.float32),
        bn2_rv=jax.random.uniform(ks[10], (Cout,), jnp.float32, 0.5, 1.5),
        ln_w=1.0 + 0.1 * jax.random.normal(ks[11], (Cout,), jnp.float32),
        ln_b=0.1 * jax.random.normal(ks[12], (Cout,), jnp.float32),
    )
    x = jax.random.normal(ks[13], (B, Cin, H, W), jnp.float32)

    out, Hout, Wout = convblock_forward(x, params)
    out = jax.block_until_ready(out)
    assert out.shape == (B, Hout * Wout, Cout)

    ref, Href, Wref = convblock_reference(x, params)
    assert (Hout, Wout) == (Href, Wref)
    diff = float(jnp.max(jnp.abs(out - ref)))
    assert np.allclose(np.asarray(out), np.asarray(ref), atol=5e-2, rtol=5e-2), diff

    print("KERNEL_OK")
</pallas_src>

<mosaic_0001>
module attributes {stable_mosaic.version = 11 : i64} {
  func.func @convblock_kernel(%arg0: memref<128x36xf32, #tpu.memory_space<vmem>>, %arg1: memref<36x32xf32, #tpu.memory_space<vmem>>, %arg2: memref<9x32x128xf32, #tpu.memory_space<vmem>>, %arg3: memref<9x32x16xf32, #tpu.memory_space<vmem>>, %arg4: memref<1x16xf32, #tpu.memory_space<vmem>>, %arg5: memref<1x16xf32, #tpu.memory_space<vmem>>, %arg6: memref<16x16xf32, #tpu.memory_space<vmem>>, %arg7: memref<1x16xf32, #tpu.memory_space<vmem>>, %arg8: memref<1x16xf32, #tpu.memory_space<vmem>>, %arg9: memref<1x16xf32, #tpu.memory_space<vmem>>, %arg10: memref<1x16xf32, #tpu.memory_space<vmem>>, %arg11: memref<32x16xf32, #tpu.memory_space<vmem>>) attributes {dimension_semantics = [], scalar_prefetch = 0 : i64, scratch_operands = 0 : i64, tpu.core_type = #tpu.core_type<tc>} {
    %c0 = arith.constant 0 : index
    %c0_0 = arith.constant 0 : index
    %0 = vector.load %arg0[%c0, %c0_0] : memref<128x36xf32, #tpu.memory_space<vmem>>, vector<128x36xf32>
    %c0_1 = arith.constant 0 : index
    %c0_2 = arith.constant 0 : index
    %1 = vector.load %arg1[%c0_1, %c0_2] : memref<36x32xf32, #tpu.memory_space<vmem>>, vector<36x32xf32>
    %cst = arith.constant dense<0.000000e+00> : vector<128x32xf32>
    %2 = tpu.matmul %0, %1, %cst {dimension_numbers = #tpu.dot_dimension_numbers<[1], [0], [0], [1], [0, 0, 1, 1], [], []>} : vector<128x36xf32>, vector<36x32xf32>, vector<128x32xf32> -> vector<128x32xf32>
    %c0_3 = arith.constant 0 : index
    %c0_4 = arith.constant 0 : index
    %c0_5 = arith.constant 0 : index
    %3 = vector.load %arg2[%c0_3, %c0_4, %c0_5] : memref<9x32x128xf32, #tpu.memory_space<vmem>>, vector<1x32x128xf32>
    %4 = vector.shape_cast %3 : vector<1x32x128xf32> to vector<32x128xf32>
    %cst_6 = arith.constant dense<0.000000e+00> : vector<32x32xf32>
    %5 = tpu.matmul %4, %2, %cst_6 {dimension_numbers = #tpu.dot_dimension_numbers<[1], [0], [0], [1], [0, 0, 1, 1], [], []>} : vector<32x128xf32>, vector<128x32xf32>, vector<32x32xf32> -> vector<32x32xf32>
    %c0_7 = arith.constant 0 : index
    %c0_8 = arith.constant 0 : index
    %c0_9 = arith.constant 0 : index
    %6 = vector.load %arg3[%c0_7, %c0_8, %c0_9] : memref<9x32x16xf32, #tpu.memory_space<vmem>>, vector<1x32x16xf32>
    %7 = vector.shape_cast %6 : vector<1x32x16xf32> to vector<32x16xf32>
    %cst_10 = arith.constant dense<0.000000e+00> : vector<32x16xf32>
    %8 = tpu.matmul %5, %7, %cst_10 {dimension_numbers = #tpu.dot_dimension_numbers<[1], [0], [0], [1], [0, 0, 1, 1], [], []>} : vector<32x32xf32>, vector<32x16xf32>, vector<32x16xf32> -> vector<32x16xf32>
    %c1 = arith.constant 1 : index
    %c0_11 = arith.constant 0 : index
    %c0_12 = arith.constant 0 : index
    %9 = vector.load %arg2[%c1, %c0_11, %c0_12] : memref<9x32x128xf32, #tpu.memory_space<vmem>>, vector<1x32x128xf32>
    %10 = vector.shape_cast %9 : vector<1x32x128xf32> to vector<32x128xf32>
    %cst_13 = arith.constant dense<0.000000e+00> : vector<32x32xf32>
    %11 = tpu.matmul %10, %2, %cst_13 {dimension_numbers = #tpu.dot_dimension_numbers<[1], [0], [0], [1], [0, 0, 1, 1], [], []>} : vector<32x128xf32>, vector<128x32xf32>, vector<32x32xf32> -> vector<32x32xf32>
    %c1_14 = arith.constant 1 : index
    %c0_15 = arith.constant 0 : index
    %c0_16 = arith.constant 0 : index
    %12 = vector.load %arg3[%c1_14, %c0_15, %c0_16] : memref<9x32x16xf32, #tpu.memory_space<vmem>>, vector<1x32x16xf32>
    %13 = vector.shape_cast %12 : vector<1x32x16xf32> to vector<32x16xf32>
    %cst_17 = arith.constant dense<0.000000e+00> : vector<32x16xf32>
    %14 = tpu.matmul %11, %13, %cst_17 {dimension_numbers = #tpu.dot_dimension_numbers<[1], [0], [0], [1], [0, 0, 1, 1], [], []>} : vector<32x32xf32>, vector<32x16xf32>, vector<32x16xf32> -> vector<32x16xf32>
    %15 = arith.addf %8, %14 : vector<32x16xf32>
    %c2 = arith.constant 2 : index
    %c0_18 = arith.constant 0 : index
    %c0_19 = arith.constant 0 : index
    %16 = vector.load %arg2[%c2, %c0_18, %c0_19] : memref<9x32x128xf32, #tpu.memory_space<vmem>>, vector<1x32x128xf32>
    %17 = vector.shape_cast %16 : vector<1x32x128xf32> to vector<32x128xf32>
    %cst_20 = arith.constant dense<0.000000e+00> : vector<32x32xf32>
    %18 = tpu.matmul %17, %2, %cst_20 {dimension_numbers = #tpu.dot_dimension_numbers<[1], [0], [0], [1], [0, 0, 1, 1], [], []>} : vector<32x128xf32>, vector<128x32xf32>, vector<32x32xf32> -> vector<32x32xf32>
    %c2_21 = arith.constant 2 : index
    %c0_22 = arith.constant 0 : index
    %c0_23 = arith.constant 0 : index
    %19 = vector.load %arg3[%c2_21, %c0_22, %c0_23] : memref<9x32x16xf32, #tpu.memory_space<vmem>>, vector<1x32x16xf32>
    %20 = vector.shape_cast %19 : vector<1x32x16xf32> to vector<32x16xf32>
    %cst_24 = arith.constant dense<0.000000e+00> : vector<32x16xf32>
    %21 = tpu.matmul %18, %20, %cst_24 {dimension_numbers = #tpu.dot_dimension_numbers<[1], [0], [0], [1], [0, 0, 1, 1], [], []>} : vector<32x32xf32>, vector<32x16xf32>, vector<32x16xf32> -> vector<32x16xf32>
    %22 = arith.addf %15, %21 : vector<32x16xf32>
    %c3 = arith.constant 3 : index
    %c0_25 = arith.constant 0 : index
    %c0_26 = arith.constant 0 : index
    %23 = vector.load %arg2[%c3, %c0_25, %c0_26] : memref<9x32x128xf32, #tpu.memory_space<vmem>>, vector<1x32x128xf32>
    %24 = vector.shape_cast %23 : vector<1x32x128xf32> to vector<32x128xf32>
    %cst_27 = arith.constant dense<0.000000e+00> : vector<32x32xf32>
    %25 = tpu.matmul %24, %2, %cst_27 {dimension_numbers = #tpu.dot_dimension_numbers<[1], [0], [0], [1], [0, 0, 1, 1], [], []>} : vector<32x128xf32>, vector<128x32xf32>, vector<32x32xf32> -> vector<32x32xf32>
    %c3_28 = arith.constant 3 : index
    %c0_29 = arith.constant 0 : index
    %c0_30 = arith.constant 0 : index
    %26 = vector.load %arg3[%c3_28, %c0_29, %c0_30] : memref<9x32x16xf32, #tpu.memory_space<vmem>>, vector<1x32x16xf32>
    %27 = vector.shape_cast %26 : vector<1x32x16xf32> to vector<32x16xf32>
    %cst_31 = arith.constant dense<0.000000e+00> : vector<32x16xf32>
    %28 = tpu.matmul %25, %27, %cst_31 {dimension_numbers = #tpu.dot_dimension_numbers<[1], [0], [0], [1], [0, 0, 1, 1], [], []>} : vector<32x32xf32>, vector<32x16xf32>, vector<32x16xf32> -> vector<32x16xf32>
    %29 = arith.addf %22, %28 : vector<32x16xf32>
    %c4 = arith.constant 4 : index
    %c0_32 = arith.constant 0 : index
    %c0_33 = arith.constant 0 : index
    %30 = vector.load %arg2[%c4, %c0_32, %c0_33] : memref<9x32x128xf32, #tpu.memory_space<vmem>>, vector<1x32x128xf32>
    %31 = vector.shape_cast %30 : vector<1x32x128xf32> to vector<32x128xf32>
    %cst_34 = arith.constant dense<0.000000e+00> : vector<32x32xf32>
    %32 = tpu.matmul %31, %2, %cst_34 {dimension_numbers = #tpu.dot_dimension_numbers<[1], [0], [0], [1], [0, 0, 1, 1], [], []>} : vector<32x128xf32>, vector<128x32xf32>, vector<32x32xf32> -> vector<32x32xf32>
    %c4_35 = arith.constant 4 : index
    %c0_36 = arith.constant 0 : index
    %c0_37 = arith.constant 0 : index
    %33 = vector.load %arg3[%c4_35, %c0_36, %c0_37] : memref<9x32x16xf32, #tpu.memory_space<vmem>>, vector<1x32x16xf32>
    %34 = vector.shape_cast %33 : vector<1x32x16xf32> to vector<32x16xf32>
    %cst_38 = arith.constant dense<0.000000e+00> : vector<32x16xf32>
    %35 = tpu.matmul %32, %34, %cst_38 {dimension_numbers = #tpu.dot_dimension_numbers<[1], [0], [0], [1], [0, 0, 1, 1], [], []>} : vector<32x32xf32>, vector<32x16xf32>, vector<32x16xf32> -> vector<32x16xf32>
    %36 = arith.addf %29, %35 : vector<32x16xf32>
    %c5 = arith.constant 5 : index
    %c0_39 = arith.constant 0 : index
    %c0_40 = arith.constant 0 : index
    %37 = vector.load %arg2[%c5, %c0_39, %c0_40] : memref<9x32x128xf32, #tpu.memory_space<vmem>>, vector<1x32x128xf32>
    %38 = vector.shape_cast %37 : vector<1x32x128xf32> to vector<32x128xf32>
    %cst_41 = arith.constant dense<0.000000e+00> : vector<32x32xf32>
    %39 = tpu.matmul %38, %2, %cst_41 {dimension_numbers = #tpu.dot_dimension_numbers<[1], [0], [0], [1], [0, 0, 1, 1], [], []>} : vector<32x128xf32>, vector<128x32xf32>, vector<32x32xf32> -> vector<32x32xf32>
    %c5_42 = arith.constant 5 : index
    %c0_43 = arith.constant 0 : index
    %c0_44 = arith.constant 0 : index
    %40 = vector.load %arg3[%c5_42, %c0_43, %c0_44] : memref<9x32x16xf32, #tpu.memory_space<vmem>>, vector<1x32x16xf32>
    %41 = vector.shape_cast %40 : vector<1x32x16xf32> to vector<32x16xf32>
    %cst_45 = arith.constant dense<0.000000e+00> : vector<32x16xf32>
    %42 = tpu.matmul %39, %41, %cst_45 {dimension_numbers = #tpu.dot_dimension_numbers<[1], [0], [0], [1], [0, 0, 1, 1], [], []>} : vector<32x32xf32>, vector<32x16xf32>, vector<32x16xf32> -> vector<32x16xf32>
    %43 = arith.addf %36, %42 : vector<32x16xf32>
    %c6 = arith.constant 6 : index
    %c0_46 = arith.constant 0 : index
    %c0_47 = arith.constant 0 : index
    %44 = vector.load %arg2[%c6, %c0_46, %c0_47] : memref<9x32x128xf32, #tpu.memory_space<vmem>>, vector<1x32x128xf32>
    %45 = vector.shape_cast %44 : vector<1x32x128xf32> to vector<32x128xf32>
    %cst_48 = arith.constant dense<0.000000e+00> : vector<32x32xf32>
    %46 = tpu.matmul %45, %2, %cst_48 {dimension_numbers = #tpu.dot_dimension_numbers<[1], [0], [0], [1], [0, 0, 1, 1], [], []>} : vector<32x128xf32>, vector<128x32xf32>, vector<32x32xf32> -> vector<32x32xf32>
    %c6_49 = arith.constant 6 : index
    %c0_50 = arith.constant 0 : index
    %c0_51 = arith.constant 0 : index
    %47 = vector.load %arg3[%c6_49, %c0_50, %c0_51] : memref<9x32x16xf32, #tpu.memory_space<vmem>>, vector<1x32x16xf32>
    %48 = vector.shape_cast %47 : vector<1x32x16xf32> to vector<32x16xf32>
    %cst_52 = arith.constant dense<0.000000e+00> : vector<32x16xf32>
    %49 = tpu.matmul %46, %48, %cst_52 {dimension_numbers = #tpu.dot_dimension_numbers<[1], [0], [0], [1], [0, 0, 1, 1], [], []>} : vector<32x32xf32>, vector<32x16xf32>, vector<32x16xf32> -> vector<32x16xf32>
    %50 = arith.addf %43, %49 : vector<32x16xf32>
    %c7 = arith.constant 7 : index
    %c0_53 = arith.constant 0 : index
    %c0_54 = arith.constant 0 : index
    %51 = vector.load %arg2[%c7, %c0_53, %c0_54] : memref<9x32x128xf32, #tpu.memory_space<vmem>>, vector<1x32x128xf32>
    %52 = vector.shape_cast %51 : vector<1x32x128xf32> to vector<32x128xf32>
    %cst_55 = arith.constant dense<0.000000e+00> : vector<32x32xf32>
    %53 = tpu.matmul %52, %2, %cst_55 {dimension_numbers = #tpu.dot_dimension_numbers<[1], [0], [0], [1], [0, 0, 1, 1], [], []>} : vector<32x128xf32>, vector<128x32xf32>, vector<32x32xf32> -> vector<32x32xf32>
    %c7_56 = arith.constant 7 : index
    %c0_57 = arith.constant 0 : index
    %c0_58 = arith.constant 0 : index
    %54 = vector.load %arg3[%c7_56, %c0_57, %c0_58] : memref<9x32x16xf32, #tpu.memory_space<vmem>>, vector<1x32x16xf32>
    %55 = vector.shape_cast %54 : vector<1x32x16xf32> to vector<32x16xf32>
    %cst_59 = arith.constant dense<0.000000e+00> : vector<32x16xf32>
    %56 = tpu.matmul %53, %55, %cst_59 {dimension_numbers = #tpu.dot_dimension_numbers<[1], [0], [0], [1], [0, 0, 1, 1], [], []>} : vector<32x32xf32>, vector<32x16xf32>, vector<32x16xf32> -> vector<32x16xf32>
    %57 = arith.addf %50, %56 : vector<32x16xf32>
    %c8 = arith.constant 8 : index
    %c0_60 = arith.constant 0 : index
    %c0_61 = arith.constant 0 : index
    %58 = vector.load %arg2[%c8, %c0_60, %c0_61] : memref<9x32x128xf32, #tpu.memory_space<vmem>>, vector<1x32x128xf32>
    %59 = vector.shape_cast %58 : vector<1x32x128xf32> to vector<32x128xf32>
    %cst_62 = arith.constant dense<0.000000e+00> : vector<32x32xf32>
    %60 = tpu.matmul %59, %2, %cst_62 {dimension_numbers = #tpu.dot_dimension_numbers<[1], [0], [0], [1], [0, 0, 1, 1], [], []>} : vector<32x128xf32>, vector<128x32xf32>, vector<32x32xf32> -> vector<32x32xf32>
    %c8_63 = arith.constant 8 : index
    %c0_64 = arith.constant 0 : index
    %c0_65 = arith.constant 0 : index
    %61 = vector.load %arg3[%c8_63, %c0_64, %c0_65] : memref<9x32x16xf32, #tpu.memory_space<vmem>>, vector<1x32x16xf32>
    %62 = vector.shape_cast %61 : vector<1x32x16xf32> to vector<32x16xf32>
    %cst_66 = arith.constant dense<0.000000e+00> : vector<32x16xf32>
    %63 = tpu.matmul %60, %62, %cst_66 {dimension_numbers = #tpu.dot_dimension_numbers<[1], [0], [0], [1], [0, 0, 1, 1], [], []>} : vector<32x32xf32>, vector<32x16xf32>, vector<32x16xf32> -> vector<32x16xf32>
    %64 = arith.addf %57, %63 : vector<32x16xf32>
    %c0_67 = arith.constant 0 : index
    %c0_68 = arith.constant 0 : index
    %65 = vector.load %arg4[%c0_67, %c0_68] : memref<1x16xf32, #tpu.memory_space<vmem>>, vector<1x16xf32>
    %66 = vector.broadcast %65 : vector<1x16xf32> to vector<32x16xf32>
    %67 = arith.mulf %64, %66 : vector<32x16xf32>
    %c0_69 = arith.constant 0 : index
    %c0_70 = arith.constant 0 : index
    %68 = vector.load %arg5[%c0_69, %c0_70] : memref<1x16xf32, #tpu.memory_space<vmem>>, vector<1x16xf32>
    %69 = vector.broadcast %68 : vector<1x16xf32> to vector<32x16xf32>
    %70 = arith.addf %67, %69 : vector<32x16xf32>
    %cst_71 = arith.constant 0.00999999977 : f32
    %71 = vector.broadcast %cst_71 : f32 to vector<32x16xf32>
    %72 = arith.mulf %71, %70 : vector<32x16xf32>
    %73 = arith.maximumf %70, %72 : vector<32x16xf32>
    %c0_72 = arith.constant 0 : index
    %c0_73 = arith.constant 0 : index
    %74 = vector.load %arg6[%c0_72, %c0_73] : memref<16x16xf32, #tpu.memory_space<vmem>>, vector<16x16xf32>
    %cst_74 = arith.constant dense<0.000000e+00> : vector<32x16xf32>
    %75 = tpu.matmul %73, %74, %cst_74 {dimension_numbers = #tpu.dot_dimension_numbers<[1], [0], [0], [1], [0, 0, 1, 1], [], []>} : vector<32x16xf32>, vector<16x16xf32>, vector<32x16xf32> -> vector<32x16xf32>
    %c0_75 = arith.constant 0 : index
    %c0_76 = arith.constant 0 : index
    %76 = vector.load %arg7[%c0_75, %c0_76] : memref<1x16xf32, #tpu.memory_space<vmem>>, vector<1x16xf32>
    %77 = vector.broadcast %76 : vector<1x16xf32> to vector<32x16xf32>
    %78 = arith.mulf %75, %77 : vector<32x16xf32>
    %c0_77 = arith.constant 0 : index
    %c0_78 = arith.constant 0 : index
    %79 = vector.load %arg8[%c0_77, %c0_78] : memref<1x16xf32, #tpu.memory_space<vmem>>, vector<1x16xf32>
    %80 = vector.broadcast %79 : vector<1x16xf32> to vector<32x16xf32>
    %81 = arith.addf %78, %80 : vector<32x16xf32>
    %cst_79 = arith.constant 0.00999999977 : f32
    %82 = vector.broadcast %cst_79 : f32 to vector<32x16xf32>
    %83 = arith.mulf %82, %81 : vector<32x16xf32>
    %84 = arith.maximumf %81, %83 : vector<32x16xf32>
    %cst_80 = arith.constant dense<0.000000e+00> : vector<32xf32>
    %85 = vector.multi_reduction <add>, %84, %cst_80 [1] : vector<32x16xf32> to vector<32xf32>
    %86 = vector.shape_cast %85 : vector<32xf32> to vector<32x1xf32>
    %cst_81 = arith.constant 1.600000e+01 : f32
    %87 = vector.broadcast %cst_81 : f32 to vector<32x1xf32>
    %88 = arith.divf %86, %87 : vector<32x1xf32>
    %89 = vector.broadcast %88 : vector<32x1xf32> to vector<32x16xf32>
    %90 = arith.subf %84, %89 : vector<32x16xf32>
    %91 = arith.mulf %90, %90 : vector<32x16xf32>
    %cst_82 = arith.constant dense<0.000000e+00> : vector<32xf32>
    %92 = vector.multi_reduction <add>, %91, %cst_82 [1] : vector<32x16xf32> to vector<32xf32>
    %93 = vector.shape_cast %92 : vector<32xf32> to vector<32x1xf32>
    %cst_83 = arith.constant 1.600000e+01 : f32
    %94 = vector.broadcast %cst_83 : f32 to vector<32x1xf32>
    %95 = arith.divf %93, %94 : vector<32x1xf32>
    %96 = vector.broadcast %88 : vector<32x1xf32> to vector<32x16xf32>
    %97 = arith.subf %84, %96 : vector<32x16xf32>
    %cst_84 = arith.constant 9.99999974E-6 : f32
    %98 = vector.broadcast %cst_84 : f32 to vector<32x1xf32>
    %99 = arith.addf %95, %98 : vector<32x1xf32>
    %100 = math.rsqrt %99 : vector<32x1xf32>
    %101 = vector.broadcast %100 : vector<32x1xf32> to vector<32x16xf32>
    %102 = arith.mulf %97, %101 : vector<32x16xf32>
    %c0_85 = arith.constant 0 : index
    %c0_86 = arith.constant 0 : index
    %103 = vector.load %arg9[%c0_85, %c0_86] : memref<1x16xf32, #tpu.memory_space<vmem>>, vector<1x16xf32>
    %104 = vector.broadcast %103 : vector<1x16xf32> to vector<32x16xf32>
    %105 = arith.mulf %102, %104 : vector<32x16xf32>
    %c0_87 = arith.constant 0 : index
    %c0_88 = arith.constant 0 : index
    %106 = vector.load %arg10[%c0_87, %c0_88] : memref<1x16xf32, #tpu.memory_space<vmem>>, vector<1x16xf32>
    %107 = vector.broadcast %106 : vector<1x16xf32> to vector<32x16xf32>
    %108 = arith.addf %105, %107 : vector<32x16xf32>
    %c0_89 = arith.constant 0 : index
    %c0_90 = arith.constant 0 : index
    %109 = vector.load %arg11[%c0_89, %c0_90] : memref<32x16xf32, #tpu.memory_space<vmem>>, vector<32x16xf32>
    tpu.vector_store %arg11[%c0_89, %c0_90], %108 {strides = array<i32>} : memref<32x16xf32, #tpu.memory_space<vmem>>, vector<32x16xf32>,
    return
  }
}

</mosaic_0001>

<bundles_post_ra>
// kernel: tpu_custom_call.1
= control target key start
LH: loop header
LB: loop body
LE: loop exit
PB: predicated region body
PF: predicated region fallthrough
CT: control target
= control target key end

     0   :  { %vm59_vm0 = vcmask 293888   ;;  %vm108_vm1 = vcmask 1043456   ;;  %vm445_vm2 = vcmask 261120   ;;  %vm2044_vm3 = vcmask 130048   ;;  %s4210_s1 = inlined_call_operand.vmem [shape: f32[36,32], index: 1, kind: input, shape index: {}]   ;;  %s4211_s0 = inlined_call_operand.vmem [shape: f32[128,36], index: 0, kind: input, shape index: {}]   ;;  %s4212_s2 = inlined_call_operand.vmem [shape: f32[9,32,128], index: 2, kind: input, shape index: {}]   ;;  %s4213_s3 = inlined_call_operand.vmem [shape: f32[9,32,16], index: 3, kind: input, shape index: {}]   ;;  %s4214_s6 = inlined_call_operand.vmem [shape: f32[16,16], index: 6, kind: input, shape index: {}]   ;;  %s4215_s4 = inlined_call_operand.vmem [shape: f32[1,16], index: 4, kind: input, shape index: {}]   ;;  %s4216_s5 = inlined_call_operand.vmem [shape: f32[1,16], index: 5, kind: input, shape index: {}]   ;;  %s4217_s7 = inlined_call_operand.vmem [shape: f32[1,16], index: 7, kind: input, shape index: {}]   ;;  %s4218_s8 = inlined_call_operand.vmem [shape: f32[1,16], index: 8, kind: input, shape index: {}]   ;;  %s4219_s9 = inlined_call_operand.vmem [shape: f32[1,16], index: 9, kind: input, shape index: {}]   ;;  %s4220_s10 = inlined_call_operand.vmem [shape: f32[1,16], index: 10, kind: input, shape index: {}]   ;;  %s4221_s11 = inlined_call_operand.vmem [shape: f32[32,16], index: 11, kind: output, shape index: {}]  }
   0x1   :  { %v54_v0 = vld [vmem:[%s4210_s1] sm:$0xff]  ;;  %v55_v1 = vld [vmem:[%s4210_s1 + $0x8] sm:$0xff]  ;;  %v56_v2 = vld [vmem:[%s4210_s1 + $0x10] sm:$0xff] }
   0x2   :  { %v3173_v3 = vpack.c.bf16 %v55_v1, %v54_v0  ;;  %v57_v4 = vld [vmem:[%s4210_s1 + $0x18] sm:$0xff]  ;;  %v38_v5 = vld [vmem:[%s4211_s0] sm:$0xff]  ;;  %v39_v8 = vld [vmem:[%s4211_s0 + $0x8] sm:$0xff] }
   0x3   :  { %v3177_v6 = vpack.c.bf16 %v57_v4, %v56_v2  ;;  %2671 = vmatprep.mubr.msk.f32.mxu0 %vm59_vm0, %v38_v5  ;;  %v58_v7 = vld [vmem:[%s4210_s1 + $0x20] sm:$0xf]  ;;  %v40_v9 = vld [vmem:[%s4211_s0 + $0x10] sm:$0xff]  ;;  %v41_v10 = vld [vmem:[%s4211_s0 + $0x18] sm:$0xff] }
   0x4   :  { %3174 = vmatprep.subr.bf16.mxu0 %v3173_v3  ;;  %v42_v11 = vld [vmem:[%s4211_s0 + $0x20] sm:$0xff]  ;;  %v43_v12 = vld [vmem:[%s4211_s0 + $0x28] sm:$0xff]  ;;  %v44_v13 = vld [vmem:[%s4211_s0 + $0x30] sm:$0xff] }
   0x5   :  { %3176 = vmatpush3.bf16.msra.mxu0 %v3173_v3  ;;  %v45_v14 = vld [vmem:[%s4211_s0 + $0x38] sm:$0xff]  ;;  %v46_v15 = vld [vmem:[%s4211_s0 + $0x40] sm:$0xff]  ;;  %v47_v16 = vld [vmem:[%s4211_s0 + $0x48] sm:$0xff] }
   0x6   :  { %3178 = vmatprep.subr.bf16.mxu0 %v3177_v6  ;;  %v48_v17 = vld [vmem:[%s4211_s0 + $0x50] sm:$0xff]  ;;  %v49_v18 = vld [vmem:[%s4211_s0 + $0x58] sm:$0xff]  ;;  %v50_v19 = vld [vmem:[%s4211_s0 + $0x60] sm:$0xff] }
   0x7   :  { %v51_v20 = vld [vmem:[%s4211_s0 + $0x68] sm:$0xff]  ;;  %v52_v21 = vld [vmem:[%s4211_s0 + $0x70] sm:$0xff]  ;;  %v53_v22 = vld [vmem:[%s4211_s0 + $0x78] sm:$0xff] }
   0x8   :  { %v257_v23 = vld [vmem:[%s4212_s2] sm:$0xff]  ;;  %v2277_v47 = vld [vmem:[%s4213_s3 + $0x28] sm:$0xff]  ;;  %v2278_v55 = vld [vmem:[%s4213_s3 + $0x30] sm:$0xff] }
   0x9   :  { %3180 = vmatpush3.bf16.msra.mxu0 %v3177_v6  ;;  %v2272_v24 = vld [vmem:[%s4212_s2 + $0x20] sm:$0xff]  ;;  %2727 = vmatprep.mubr.f32.mxu1 %v257_v23  ;;  %v347_v49 = vld [vmem:[%s4213_s3 + $0x8] sm:$0xff]  ;;  %v2279_v56 = vld [vmem:[%s4213_s3 + $0x38] sm:$0xff] }
   0xa   :  { %2669 = vmatprep.subr.msk.mxu0 %vm108_vm1, %v58_v7  ;;  %v2276_v46 = vld [vmem:[%s4213_s3 + $0x20] sm:$0xff]  ;;  %v348_v57 = vld [vmem:[%s4213_s3 + $0x10] sm:$0xff]  ;;  %v349_v58 = vld [vmem:[%s4213_s3 + $0x18] sm:$0xff]  ;;  %v3249_v61 = vpack.c.bf16 %v2279_v56, %v2278_v55 }
   0xb   :  { %v346_v48 = vld [vmem:[%s4213_s3] sm:$0xff]  ;;  %v3245_v53 = vpack.c.bf16 %v2277_v47, %v2276_v46  ;;  %v258_v59 = vld [vmem:[%s4212_s2 + $0x8] sm:$0xff]  ;;  %v2274_v62 = vld [vmem:[%s4212_s2 + $0x30] sm:$0xff]  ;;  %v3257_v63 = vpack.c.bf16 %v349_v58, %v348_v57 }
   0xc   :  { %v3253_v54 = vpack.c.bf16 %v347_v49, %v346_v48  ;;  %v2273_v60 = vld [vmem:[%s4212_s2 + $0x28] sm:$0xff]  ;;  %v259_v0 = vld [vmem:[%s4212_s2 + $0x10] sm:$0xff]  ;;  %v2275_v1 = vld [vmem:[%s4212_s2 + $0x38] sm:$0xff] }
   0xd   :  { %2670 = vmatpush3.msk.msra.mxu0 %vm108_vm1, %v58_v7  ;;  %v260_v2 = vld [vmem:[%s4212_s2 + $0x18] sm:$0xff]  ;;  %v2292_v3 = vld [vmem:[%s4213_s3 + $0x40] sm:$0xff]  ;;  %v2293_v4 = vld [vmem:[%s4213_s3 + $0x48] sm:$0xff] }
   0xe   :  { %2672 = vmatmul.mubr.msk.f32.vlgmr.msra.gmra.mrb[0].mxu0 %vm59_vm0, %v39_v8  ;;  %v3293_v5 = vpack.c.bf16 %v2293_v4, %v2292_v3  ;;  %v2294_v6 = vld [vmem:[%s4213_s3 + $0x50] sm:$0xff]  ;;  %v2295_v7 = vld [vmem:[%s4213_s3 + $0x58] sm:$0xff]  ;;  %v2336_v23 = vld [vmem:[%s4212_s2 + $0xc0] sm:$0xff] }
   0xf   :  { %2674 = vmatprep.mubr.msk.f32.mxu0 %vm59_vm0, %v40_v9  ;;  %v2306_v46 = vld [vmem:[%s4213_s3 + $0x70] sm:$0xff]  ;;  %v2307_v47 = vld [vmem:[%s4213_s3 + $0x78] sm:$0xff]  ;;  %v2301_v48 = vld [vmem:[%s4212_s2 + $0x68] sm:$0xff] }
  0x10   :  { %v2302_v49 = vld [vmem:[%s4212_s2 + $0x70] sm:$0xff]  ;;  %v2351_v3 = vld [vmem:[%s4212_s2 + $0xf8] sm:$0xff] }
  0x11   :  { %v2318_v4 = vld [vmem:[%s4213_s3 + $0x90] sm:$0xff] }
  0x12   :  { %2675 = vmatmul.mubr.msk.f32.gmra.mrb[2].mxu0 %vm59_vm0, %v41_v10 }
  0x13   :  { %2677 = vmatprep.mubr.msk.f32.mxu0 %vm59_vm0, %v42_v11 }
  0x16   :  { %2678 = vmatmul.mubr.msk.f32.gmra.mrb[4].mxu0 %vm59_vm0, %v43_v12  ;;  %v3297_v12 = vpack.c.bf16 %v2295_v7, %v2294_v6 }
  0x17   :  { %2680 = vmatprep.mubr.msk.f32.mxu0 %vm59_vm0, %v44_v13 }
  0x1a   :  { %2681 = vmatmul.mubr.msk.f32.gmra.mrb[6].mxu0 %vm59_vm0, %v45_v14 }
  0x1b   :  { %2683 = vmatprep.mubr.msk.f32.mxu0 %vm59_vm0, %v46_v15  ;;  %v2288_v15 = vld [vmem:[%s4212_s2 + $0x40] sm:$0xff] }
  0x1e   :  { %2684 = vmatmul.mubr.msk.f32.gmra.mrb[8].mxu0 %vm59_vm0, %v47_v16  ;;  %v2289_v16 = vld [vmem:[%s4212_s2 + $0x48] sm:$0xff] }
  0x1f   :  { %2686 = vmatprep.mubr.msk.f32.mxu0 %vm59_vm0, %v48_v17  ;;  %v2290_v17 = vld [vmem:[%s4212_s2 + $0x50] sm:$0xff] }
  0x22   :  { %2687 = vmatmul.mubr.msk.f32.gmra.mrb[10].mxu0 %vm59_vm0, %v49_v18  ;;  %v2291_v18 = vld [vmem:[%s4212_s2 + $0x58] sm:$0xff] }
  0x23   :  { %2689 = vmatprep.mubr.msk.f32.mxu0 %vm59_vm0, %v50_v19  ;;  %v2312_v19 = vld [vmem:[%s4212_s2 + $0x80] sm:$0xff] }
  0x26   :  { %2690 = vmatmul.mubr.msk.f32.gmra.mrb[12].mxu0 %vm59_vm0, %v51_v20  ;;  %v2313_v20 = vld [vmem:[%s4212_s2 + $0x88] sm:$0xff] }
  0x27   :  { %2692 = vmatprep.mubr.msk.f32.mxu0 %vm59_vm0, %v52_v21  ;;  %v2314_v21 = vld [vmem:[%s4212_s2 + $0x90] sm:$0xff] }
  0x2a   :  { %2693 = vmatmul.mubr.msk.f32.gmra.mrb[14].mxu0 %vm59_vm0, %v53_v22  ;;  %v2315_v22 = vld [vmem:[%s4212_s2 + $0x98] sm:$0xff] }
  0x2b   :  { %2765 = vmatprep.mubr.f32.mxu0 %v2272_v24 }
  0xe1   :  { %v2673_v25 = vpop.f32.mrb[0].mxu0 }
  0xe2   :  { %v178_v26 = vpop.f32.mrb[1].mxu0 }
  0xe3   :  { %v3734_v27 = vpack.c.bf16 %v2673_v25, %v178_v26  ;;  %v2337_v26 = vld [vmem:[%s4212_s2 + $0xc8] sm:$0xff] }
  0xe5   :  { %v2676_v28 = vpop.f32.mrb[2].mxu0  ;;  %3182 = vmatprep.subr.bf16.mxu1 %v3734_v27  ;;  %3214 = vmatprep.subr.bf16.mxu0 %v3734_v27 }
  0xe6   :  { %v188_v29 = vpop.f32.mrb[3].mxu0  ;;  %3184 = vmatpush3.bf16.msra.mxu1 %v3734_v27  ;;  %3216 = vmatpush3.bf16.msra.mxu0 %v3734_v27 }
  0xe7   :  { %v3740_v30 = vpack.c.bf16 %v2676_v28, %v188_v29 }
  0xe9   :  { %v2679_v31 = vpop.f32.mrb[4].mxu0  ;;  %3186 = vmatprep.subr.bf16.mxu1 %v3740_v30  ;;  %3218 = vmatprep.subr.bf16.mxu0 %v3740_v30 }
  0xea   :  { %v198_v32 = vpop.f32.mrb[5].mxu0  ;;  %3188 = vmatpush3.bf16.msra.mxu1 %v3740_v30  ;;  %3220 = vmatpush3.bf16.msra.mxu0 %v3740_v30 }
  0xeb   :  { %v3746_v33 = vpack.c.bf16 %v2679_v31, %v198_v32 }
  0xed   :  { %v2682_v34 = vpop.f32.mrb[6].mxu0  ;;  %3190 = vmatprep.subr.bf16.mxu1 %v3746_v33  ;;  %3222 = vmatprep.subr.bf16.mxu0 %v3746_v33 }
  0xee   :  { %v208_v35 = vpop.f32.mrb[7].mxu0  ;;  %3192 = vmatpush3.bf16.msra.mxu1 %v3746_v33  ;;  %3224 = vmatpush3.bf16.msra.mxu0 %v3746_v33 }
  0xef   :  { %v3752_v36 = vpack.c.bf16 %v2682_v34, %v208_v35 }
  0xf1   :  { %v2685_v37 = vpop.f32.mrb[8].mxu0  ;;  %3194 = vmatprep.subr.bf16.mxu1 %v3752_v36  ;;  %3226 = vmatprep.subr.bf16.mxu0 %v3752_v36 }
  0xf2   :  { %v218_v38 = vpop.f32.mrb[9].mxu0  ;;  %3196 = vmatpush3.bf16.msra.mxu1 %v3752_v36  ;;  %3228 = vmatpush3.bf16.msra.mxu0 %v3752_v36 }
  0xf3   :  { %v3758_v39 = vpack.c.bf16 %v2685_v37, %v218_v38 }
  0xf5   :  { %v2688_v40 = vpop.f32.mrb[10].mxu0  ;;  %3198 = vmatprep.subr.bf16.mxu1 %v3758_v39  ;;  %3230 = vmatprep.subr.bf16.mxu0 %v3758_v39 }
  0xf6   :  { %v228_v41 = vpop.f32.mrb[11].mxu0  ;;  %3200 = vmatpush3.bf16.msra.mxu1 %v3758_v39  ;;  %3232 = vmatpush3.bf16.msra.mxu0 %v3758_v39 }
  0xf7   :  { %v3764_v42 = vpack.c.bf16 %v2688_v40, %v228_v41  ;;  %v2300_v40 = vld [vmem:[%s4212_s2 + $0x60] sm:$0xff] }
  0xf8   :  { %v2304_v41 = vld [vmem:[%s4213_s3 + $0x60] sm:$0xff] }
  0xf9   :  { %v2691_v43 = vpop.f32.mrb[12].mxu0  ;;  %3202 = vmatprep.subr.bf16.mxu1 %v3764_v42  ;;  %3234 = vmatprep.subr.bf16.mxu0 %v3764_v42 }
  0xfa   :  { %v238_v44 = vpop.f32.mrb[13].mxu0  ;;  %3204 = vmatpush3.bf16.msra.mxu1 %v3764_v42  ;;  %3236 = vmatpush3.bf16.msra.mxu0 %v3764_v42 }
  0xfb   :  { %v3770_v45 = vpack.c.bf16 %v2691_v43, %v238_v44  ;;  %v2305_v43 = vld [vmem:[%s4213_s3 + $0x68] sm:$0xff] }
  0xfc   :  { %v3333_v44 = vpack.c.bf16 %v2305_v43, %v2304_v41 }
  0xfd   :  { %v2694_v50 = vpop.f32.mrb[14].mxu0  ;;  %3206 = vmatprep.subr.bf16.mxu1 %v3770_v45  ;;  %3238 = vmatprep.subr.bf16.mxu0 %v3770_v45 }
  0xfe   :  { %v248_v51 = vpop.f32.mrb[15].mxu0  ;;  %3208 = vmatpush3.bf16.msra.mxu1 %v3770_v45  ;;  %3240 = vmatpush3.bf16.msra.mxu0 %v3770_v45 }
  0xff   :  { %v3788_v52 = vpack.c.bf16 %v2694_v50, %v248_v51  ;;  %v3337_v50 = vpack.c.bf16 %v2307_v47, %v2306_v46  ;;  %v2303_v51 = vld [vmem:[%s4212_s2 + $0x78] sm:$0xff]  ;;  %v2352_v46 = vld [vmem:[%s4213_s3 + $0xe0] sm:$0xff]  ;;  %v2353_v47 = vld [vmem:[%s4213_s3 + $0xe8] sm:$0xff] }
 0x101   :  { %3210 = vmatprep.subr.bf16.mxu1 %v3788_v52  ;;  %3242 = vmatprep.subr.bf16.mxu0 %v3788_v52 }
 0x102   :  { %3212 = vmatpush3.bf16.msra.mxu1 %v3788_v52  ;;  %3244 = vmatpush3.bf16.msra.mxu0 %v3788_v52 }
 0x103   :  { %3246 = vmatprep.subr.bf16.mxu0 %v3245_v53  ;;  %3254 = vmatprep.subr.bf16.mxu1 %v3253_v54 }
 0x105   :  { %2728 = vmatmul.mubr.f32.vlgmr.msra.gmra.mrb[0].mxu1 %v258_v59  ;;  %2766 = vmatmul.mubr.f32.vlgmr.msra.gmra.mrb[16].mxu0 %v2273_v60  ;;  %v2338_v60 = vld [vmem:[%s4212_s2 + $0xd0] sm:$0xff] }
 0x106   :  { %3248 = vmatpush3.bf16.msra.mxu0 %v3245_v53  ;;  %2768 = vmatprep.mubr.f32.mxu0 %v2274_v62  ;;  %v2316_v53 = vld [vmem:[%s4213_s3 + $0x80] sm:$0xff] }
 0x107   :  { %3250 = vmatprep.subr.bf16.mxu0 %v3249_v61  ;;  %3256 = vmatpush3.bf16.msra.mxu1 %v3253_v54  ;;  %v2317_v54 = vld [vmem:[%s4213_s3 + $0x88] sm:$0xff]  ;;  %v2348_v62 = vld [vmem:[%s4212_s2 + $0xe0] sm:$0xff] }
 0x108   :  { %2730 = vmatprep.mubr.f32.mxu1 %v259_v0  ;;  %3258 = vmatprep.subr.bf16.mxu1 %v3257_v63  ;;  %v3373_v55 = vpack.c.bf16 %v2317_v54, %v2316_v53  ;;  %v2355_v53 = vld [vmem:[%s4213_s3 + $0xf8] sm:$0xff] }
 0x109   :  { %2769 = vmatmul.mubr.f32.gmra.mrb[18].mxu0 %v2275_v1  ;;  %2731 = vmatmul.mubr.f32.gmra.mrb[2].mxu1 %v260_v2  ;;  %v2349_v1 = vld [vmem:[%s4212_s2 + $0xe8] sm:$0xff]  ;;  %v2350_v2 = vld [vmem:[%s4212_s2 + $0xf0] sm:$0xff] }
 0x10a   :  { %3252 = vmatpush3.bf16.msra.mxu0 %v3249_v61  ;;  %v2339_v61 = vld [vmem:[%s4212_s2 + $0xd8] sm:$0xff] }
 0x10b   :  { %3262 = vmatprep.subr.bf16.mxu0 %v3734_v27  ;;  %3260 = vmatpush3.bf16.msra.mxu1 %v3257_v63 }
 0x10c   :  { %3294 = vmatprep.subr.bf16.mxu1 %v3293_v5 }
 0x1d8   :  { %v2729_v8 = vpop.f32.mrb[0].mxu1  ;;  %v2767_v9 = vpop.f32.mrb[16].mxu0 }
 0x1d9   :  { %v327_v10 = vpop.f32.mrb[1].mxu1  ;;  %v421_v11 = vpop.f32.mrb[17].mxu0 }
 0x1da   :  { %2779 = vmatprep.mubr.msk.f32.mxu0 %vm445_vm2, %v421_v11  ;;  %2793 = vmatprep.mubr.msk.f32.mxu1 %vm445_vm2, %v327_v10  ;;  %v2324_v11 = vld [vmem:[%s4212_s2 + $0xa0] sm:$0xff] }
 0x1db   :  { %2780 = vmatmul.mubr.msk.f32.vlgmr.msra.gmra.mrb[20].mxu0 %vm445_vm2, %v2767_v9  ;;  %2794 = vmatmul.mubr.msk.f32.vlgmr.msra.gmra.mrb[4].mxu1 %vm445_vm2, %v2729_v8 }
 0x1dc   :  { %3264 = vmatpush3.bf16.msra.mxu0 %v3734_v27  ;;  %3296 = vmatpush3.bf16.msra.mxu1 %v3293_v5  ;;  %v2770_v13 = vpop.f32.mrb[18].mxu0  ;;  %v2732_v24 = vpop.f32.mrb[2].mxu1  ;;  %v2319_v5 = vld [vmem:[%s4213_s3 + $0x98] sm:$0xff] }
 0x1dd   :  { %3266 = vmatprep.subr.bf16.mxu0 %v3740_v30  ;;  %3298 = vmatprep.subr.bf16.mxu1 %v3297_v12  ;;  %v431_v14 = vpop.f32.mrb[19].mxu0  ;;  %v337_v25 = vpop.f32.mrb[3].mxu1  ;;  %v3377_v8 = vpack.c.bf16 %v2319_v5, %v2318_v4 }
 0x1de   :  { %2782 = vmatprep.mubr.msk.f32.mxu0 %vm445_vm2, %v431_v14  ;;  %2796 = vmatprep.mubr.msk.f32.mxu1 %vm445_vm2, %v337_v25 }
 0x1df   :  { %2783 = vmatmul.mubr.msk.f32.gmra.mrb[22].mxu0 %vm445_vm2, %v2770_v13  ;;  %2797 = vmatmul.mubr.msk.f32.gmra.mrb[6].mxu1 %vm445_vm2, %v2732_v24  ;;  %v2329_v13 = vld [vmem:[%s4213_s3 + $0xa8] sm:$0xff] }
 0x1e0   :  { %3268 = vmatpush3.bf16.msra.mxu0 %v3740_v30  ;;  %3300 = vmatpush3.bf16.msra.mxu1 %v3297_v12  ;;  %v2328_v12 = vld [vmem:[%s4213_s3 + $0xa0] sm:$0xff] }
 0x1e1   :  { %3270 = vmatprep.subr.bf16.mxu0 %v3746_v33  ;;  %3302 = vmatprep.subr.bf16.mxu1 %v3734_v27  ;;  %v3413_v14 = vpack.c.bf16 %v2329_v13, %v2328_v12 }
 0x1e2   :  { %2831 = vmatprep.mubr.f32.mxu0 %v2288_v15  ;;  %v2330_v15 = vld [vmem:[%s4213_s3 + $0xb0] sm:$0xff] }
 0x1e4   :  { %3272 = vmatpush3.bf16.msra.mxu0 %v3746_v33 }
 0x1e5   :  { %3274 = vmatprep.subr.bf16.mxu0 %v3752_v36 }
 0x1e8   :  { %3276 = vmatpush3.bf16.msra.mxu0 %v3752_v36 }
 0x1e9   :  { %3278 = vmatprep.subr.bf16.mxu0 %v3758_v39 }
 0x1ec   :  { %3280 = vmatpush3.bf16.msra.mxu0 %v3758_v39 }
 0x1ed   :  { %3282 = vmatprep.subr.bf16.mxu0 %v3764_v42 }
 0x1f0   :  { %3284 = vmatpush3.bf16.msra.mxu0 %v3764_v42 }
 0x1f1   :  { %3286 = vmatprep.subr.bf16.mxu0 %v3770_v45 }
 0x1f4   :  { %3288 = vmatpush3.bf16.msra.mxu0 %v3770_v45 }
 0x1f5   :  { %3290 = vmatprep.subr.bf16.mxu0 %v3788_v52 }
 0x1f8   :  { %3292 = vmatpush3.bf16.msra.mxu0 %v3788_v52 }
 0x1f9   :  { %3342 = vmatprep.subr.bf16.mxu0 %v3734_v27 }
 0x1fb   :  { %2832 = vmatmul.mubr.f32.vlgmr.msra.gmra.mrb[24].mxu0 %v2289_v16  ;;  %v2331_v16 = vld [vmem:[%s4213_s3 + $0xb8] sm:$0xff] }
 0x1fc   :  { %3344 = vmatpush3.bf16.msra.mxu0 %v3734_v27  ;;  %2834 = vmatprep.mubr.f32.mxu0 %v2290_v17  ;;  %v2325_v17 = vld [vmem:[%s4212_s2 + $0xa8] sm:$0xff] }
 0x1fd   :  { %3346 = vmatprep.subr.bf16.mxu0 %v3740_v30 }
 0x1ff   :  { %2835 = vmatmul.mubr.f32.gmra.mrb[26].mxu0 %v2291_v18  ;;  %v2326_v18 = vld [vmem:[%s4212_s2 + $0xb0] sm:$0xff] }
 0x200   :  { %3348 = vmatpush3.bf16.msra.mxu0 %v3740_v30  ;;  %2935 = vmatprep.mubr.f32.mxu0 %v2312_v19  ;;  %v3417_v19 = vpack.c.bf16 %v2331_v16, %v2330_v15 }
 0x201   :  { %3350 = vmatprep.subr.bf16.mxu0 %v3746_v33 }
 0x204   :  { %3352 = vmatpush3.bf16.msra.mxu0 %v3746_v33 }
 0x205   :  { %3354 = vmatprep.subr.bf16.mxu0 %v3752_v36 }
 0x208   :  { %3356 = vmatpush3.bf16.msra.mxu0 %v3752_v36 }
 0x209   :  { %3358 = vmatprep.subr.bf16.mxu0 %v3758_v39 }
 0x20c   :  { %3360 = vmatpush3.bf16.msra.mxu0 %v3758_v39 }
 0x20d   :  { %3362 = vmatprep.subr.bf16.mxu0 %v3764_v42 }
 0x210   :  { %3364 = vmatpush3.bf16.msra.mxu0 %v3764_v42 }
 0x211   :  { %3366 = vmatprep.subr.bf16.mxu0 %v3770_v45 }
 0x214   :  { %3368 = vmatpush3.bf16.msra.mxu0 %v3770_v45 }
 0x215   :  { %3370 = vmatprep.subr.bf16.mxu0 %v3788_v52 }
 0x218   :  { %3372 = vmatpush3.bf16.msra.mxu0 %v3788_v52 }
 0x219   :  { %3422 = vmatprep.subr.bf16.mxu0 %v3734_v27 }
 0x21b   :  { %2936 = vmatmul.mubr.f32.vlgmr.msra.gmra.mrb[28].mxu0 %v2313_v20  ;;  %v2327_v20 = vld [vmem:[%s4212_s2 + $0xb8] sm:$0xff] }
 0x21c   :  { %3424 = vmatpush3.bf16.msra.mxu0 %v3734_v27  ;;  %2938 = vmatprep.mubr.f32.mxu0 %v2314_v21  ;;  %v2340_v21 = vld [vmem:[%s4213_s3 + $0xc0] sm:$0xff] }
 0x21d   :  { %3426 = vmatprep.subr.bf16.mxu0 %v3740_v30 }
 0x21f   :  { %2939 = vmatmul.mubr.f32.gmra.mrb[30].mxu0 %v2315_v22  ;;  %v2341_v22 = vld [vmem:[%s4213_s3 + $0xc8] sm:$0xff] }
 0x220   :  { %3428 = vmatpush3.bf16.msra.mxu0 %v3740_v30  ;;  %3039 = vmatprep.mubr.f32.mxu0 %v2336_v23  ;;  %v3453_v23 = vpack.c.bf16 %v2341_v22, %v2340_v21 }
 0x221   :  { %3430 = vmatprep.subr.bf16.mxu0 %v3746_v33 }
 0x224   :  { %3432 = vmatpush3.bf16.msra.mxu0 %v3746_v33 }
 0x225   :  { %3434 = vmatprep.subr.bf16.mxu0 %v3752_v36 }
 0x228   :  { %3436 = vmatpush3.bf16.msra.mxu0 %v3752_v36 }
 0x229   :  { %3438 = vmatprep.subr.bf16.mxu0 %v3758_v39 }
 0x22c   :  { %3440 = vmatpush3.bf16.msra.mxu0 %v3758_v39 }
 0x22d   :  { %3442 = vmatprep.subr.bf16.mxu0 %v3764_v42 }
 0x230   :  { %3444 = vmatpush3.bf16.msra.mxu0 %v3764_v42 }
 0x231   :  { %3446 = vmatprep.subr.bf16.mxu0 %v3770_v45 }
 0x234   :  { %3448 = vmatpush3.bf16.msra.mxu0 %v3770_v45 }
 0x235   :  { %3450 = vmatprep.subr.bf16.mxu0 %v3788_v52 }
 0x238   :  { %3452 = vmatpush3.bf16.msra.mxu0 %v3788_v52 }
 0x239   :  { %3462 = vmatprep.subr.bf16.mxu0 %v3734_v27 }
 0x23b   :  { %3040 = vmatmul.mubr.f32.vlgmr.msra.gmra.mrb[32].mxu0 %v2337_v26 }
 0x23c   :  { %3464 = vmatpush3.bf16.msra.mxu0 %v3734_v27  ;;  %3042 = vmatprep.mubr.f32.mxu0 %v2338_v60 }
 0x23d   :  { %3466 = vmatprep.subr.bf16.mxu0 %v3740_v30 }
 0x23f   :  { %3043 = vmatmul.mubr.f32.gmra.mrb[34].mxu0 %v2339_v61 }
 0x240   :  { %3468 = vmatpush3.bf16.msra.mxu0 %v3740_v30  ;;  %3091 = vmatprep.mubr.f32.mxu0 %v2348_v62 }
 0x241   :  { %3470 = vmatprep.subr.bf16.mxu0 %v3746_v33 }
 0x244   :  { %3472 = vmatpush3.bf16.msra.mxu0 %v3746_v33 }
 0x245   :  { %3474 = vmatprep.subr.bf16.mxu0 %v3752_v36 }
 0x248   :  { %3476 = vmatpush3.bf16.msra.mxu0 %v3752_v36 }
 0x249   :  { %3478 = vmatprep.subr.bf16.mxu0 %v3758_v39 }
 0x24c   :  { %3480 = vmatpush3.bf16.msra.mxu0 %v3758_v39 }
 0x24d   :  { %3482 = vmatprep.subr.bf16.mxu0 %v3764_v42 }
 0x250   :  { %3484 = vmatpush3.bf16.msra.mxu0 %v3764_v42 }
 0x251   :  { %3486 = vmatprep.subr.bf16.mxu0 %v3770_v45 }
 0x254   :  { %3488 = vmatpush3.bf16.msra.mxu0 %v3770_v45 }
 0x255   :  { %3490 = vmatprep.subr.bf16.mxu0 %v3788_v52 }
 0x258   :  { %3492 = vmatpush3.bf16.msra.mxu0 %v3788_v52 }
 0x25b   :  { %3092 = vmatmul.mubr.f32.vlgmr.msra.gmra.mrb[36].mxu0 %v2349_v1  ;;  %v2042_v1 = vld [vmem:[%s4214_s6] sm:$0xff] }
 0x25c   :  { %3094 = vmatprep.mubr.f32.mxu0 %v2350_v2 }
 0x25f   :  { %3095 = vmatmul.mubr.f32.gmra.mrb[38].mxu0 %v2351_v3  ;;  %v2372_v3 = vld [vmem:[%s4215_s4] ss:$0 sm:$0xff] }
 0x2ae   :  { %v3939_v28 = vpop.f32.mrb[20].mxu0 }
 0x2af   :  { %v3941_v29 = vpop.f32.mrb[21].mxu0 }
 0x2b2   :  { %v3943_v31 = vpop.f32.mrb[22].mxu0 }
 0x2b3   :  { %v3945_v32 = vpop.f32.mrb[23].mxu0 }
 0x2ce   :  { %v2833_v34 = vpop.f32.mrb[24].mxu0 }
 0x2cf   :  { %v711_v35 = vpop.f32.mrb[25].mxu0 }
 0x2d0   :  { %2845 = vmatprep.mubr.msk.f32.mxu1 %vm445_vm2, %v711_v35 }
 0x2d1   :  { %2846 = vmatmul.mubr.msk.f32.vlgmr.msra.gmra.mrb[4].mxu1 %vm445_vm2, %v2833_v34 }
 0x2d2   :  { %3304 = vmatpush3.bf16.msra.mxu1 %v3734_v27  ;;  %v2836_v37 = vpop.f32.mrb[26].mxu0 }
 0x2d3   :  { %3306 = vmatprep.subr.bf16.mxu1 %v3740_v30  ;;  %v721_v38 = vpop.f32.mrb[27].mxu0 }
 0x2d4   :  { %2848 = vmatprep.mubr.msk.f32.mxu1 %vm445_vm2, %v721_v38  ;;  %v2342_v38 = vld [vmem:[%s4213_s3 + $0xd0] sm:$0xff] }
 0x2d5   :  { %2849 = vmatmul.mubr.msk.f32.gmra.mrb[6].mxu1 %vm445_vm2, %v2836_v37 }
 0x2d6   :  { %3308 = vmatpush3.bf16.msra.mxu1 %v3740_v30  ;;  %2883 = vmatprep.mubr.f32.mxu1 %v2300_v40  ;;  %v2343_v40 = vld [vmem:[%s4213_s3 + $0xd8] sm:$0xff] }
 0x2d7   :  { %3310 = vmatprep.subr.bf16.mxu1 %v3746_v33 }
 0x2da   :  { %3312 = vmatpush3.bf16.msra.mxu1 %v3746_v33 }
 0x2db   :  { %3314 = vmatprep.subr.bf16.mxu1 %v3752_v36 }
 0x2de   :  { %3316 = vmatpush3.bf16.msra.mxu1 %v3752_v36 }
 0x2df   :  { %3318 = vmatprep.subr.bf16.mxu1 %v3758_v39 }
 0x2e2   :  { %3320 = vmatpush3.bf16.msra.mxu1 %v3758_v39 }
 0x2e3   :  { %3322 = vmatprep.subr.bf16.mxu1 %v3764_v42 }
 0x2e6   :  { %3324 = vmatpush3.bf16.msra.mxu1 %v3764_v42 }
 0x2e7   :  { %3326 = vmatprep.subr.bf16.mxu1 %v3770_v45 }
 0x2ea   :  { %3328 = vmatpush3.bf16.msra.mxu1 %v3770_v45 }
 0x2eb   :  { %3330 = vmatprep.subr.bf16.mxu1 %v3788_v52 }
 0x2ee   :  { %3332 = vmatpush3.bf16.msra.mxu1 %v3788_v52  ;;  %v2937_v56 = vpop.f32.mrb[28].mxu0 }
 0x2ef   :  { %3334 = vmatprep.subr.bf16.mxu1 %v3333_v44  ;;  %v1103_v57 = vpop.f32.mrb[29].mxu0 }
 0x2f1   :  { %2884 = vmatmul.mubr.f32.vlgmr.msra.gmra.mrb[8].mxu1 %v2301_v48 }
 0x2f2   :  { %2886 = vmatprep.mubr.f32.mxu1 %v2302_v49  ;;  %3336 = vmatpush3.bf16.msra.mxu1 %v3333_v44  ;;  %v2940_v58 = vpop.f32.mrb[30].mxu0  ;;  %v3457_v44 = vpack.c.bf16 %v2343_v40, %v2342_v38 }
 0x2f3   :  { %3338 = vmatprep.subr.bf16.mxu1 %v3337_v50  ;;  %v1113_v59 = vpop.f32.mrb[31].mxu0 }
 0x2f5   :  { %2887 = vmatmul.mubr.f32.gmra.mrb[10].mxu1 %v2303_v51  ;;  %v2354_v51 = vld [vmem:[%s4213_s3 + $0xf0] sm:$0xff] }
 0x2f6   :  { %3340 = vmatpush3.bf16.msra.mxu1 %v3337_v50  ;;  %v3493_v50 = vpack.c.bf16 %v2353_v47, %v2352_v46  ;;  %v3497_v54 = vpack.c.bf16 %v2355_v53, %v2354_v51 }
 0x2f7   :  { %3374 = vmatprep.subr.bf16.mxu1 %v3373_v55 }
 0x30e   :  { %v4005_v63 = vpop.f32.mrb[32].mxu0 }
 0x30f   :  { %v4007_v0 = vpop.f32.mrb[33].mxu0 }
 0x312   :  { %v3044_v24 = vpop.f32.mrb[34].mxu0 }
 0x313   :  { %v1505_v25 = vpop.f32.mrb[35].mxu0 }
 0x32e   :  { %v3093_v26 = vpop.f32.mrb[36].mxu0 }
 0x32f   :  { %v1691_v34 = vpop.f32.mrb[37].mxu0 }
 0x332   :  { %v3096_v35 = vpop.f32.mrb[38].mxu0 }
 0x333   :  { %v1701_v37 = vpop.f32.mrb[39].mxu0 }
 0x3c4   :  { %v2885_v6 = vpop.f32.mrb[8].mxu1 }
 0x3c5   :  { %v907_v7 = vpop.f32.mrb[9].mxu1 }
 0x3c6   :  { %2897 = vmatprep.mubr.msk.f32.mxu1 %vm445_vm2, %v907_v7 }
 0x3c7   :  { %2898 = vmatmul.mubr.msk.f32.vlgmr.msra.gmra.mrb[4].mxu1 %vm445_vm2, %v2885_v6  ;;  %v2373_v6 = vld [vmem:[%s4216_s5] ss:$0 sm:$0xff] }
 0x3c8   :  { %3376 = vmatpush3.bf16.msra.mxu1 %v3373_v55  ;;  %v2888_v9 = vpop.f32.mrb[10].mxu1  ;;  %v2360_v55 = vld [vmem:[%s4212_s2 + $0x100] sm:$0xff] }
 0x3c9   :  { %v917_v10 = vpop.f32.mrb[11].mxu1  ;;  %3378 = vmatprep.subr.bf16.mxu1 %v3377_v8 }
 0x3ca   :  { %2900 = vmatprep.mubr.msk.f32.mxu1 %vm445_vm2, %v917_v10 }
 0x3cb   :  { %2901 = vmatmul.mubr.msk.f32.gmra.mrb[6].mxu1 %vm445_vm2, %v2888_v9 }
 0x3cc   :  { %3380 = vmatpush3.bf16.msra.mxu1 %v3377_v8  ;;  %2949 = vmatprep.mubr.msk.f32.mxu1 %vm445_vm2, %v1103_v57 }
 0x3cd   :  { %3382 = vmatprep.subr.bf16.mxu1 %v3734_v27 }
 0x3cf   :  { %2950 = vmatmul.mubr.msk.f32.vlgmr.msra.gmra.mrb[4].mxu1 %vm445_vm2, %v2937_v56 }
 0x3d0   :  { %3384 = vmatpush3.bf16.msra.mxu1 %v3734_v27  ;;  %2952 = vmatprep.mubr.msk.f32.mxu1 %vm445_vm2, %v1113_v59 }
 0x3d1   :  { %3386 = vmatprep.subr.bf16.mxu1 %v3740_v30 }
 0x3d3   :  { %2953 = vmatmul.mubr.msk.f32.gmra.mrb[6].mxu1 %vm445_vm2, %v2940_v58 }
 0x3d4   :  { %3388 = vmatpush3.bf16.msra.mxu1 %v3740_v30  ;;  %2987 = vmatprep.mubr.f32.mxu1 %v2324_v11 }
 0x3d5   :  { %3390 = vmatprep.subr.bf16.mxu1 %v3746_v33 }
 0x3d8   :  { %3392 = vmatpush3.bf16.msra.mxu1 %v3746_v33 }
 0x3d9   :  { %3394 = vmatprep.subr.bf16.mxu1 %v3752_v36 }
 0x3dc   :  { %3396 = vmatpush3.bf16.msra.mxu1 %v3752_v36 }
 0x3dd   :  { %3398 = vmatprep.subr.bf16.mxu1 %v3758_v39 }
 0x3e0   :  { %3400 = vmatpush3.bf16.msra.mxu1 %v3758_v39 }
 0x3e1   :  { %3402 = vmatprep.subr.bf16.mxu1 %v3764_v42 }
 0x3e4   :  { %3404 = vmatpush3.bf16.msra.mxu1 %v3764_v42 }
 0x3e5   :  { %3406 = vmatprep.subr.bf16.mxu1 %v3770_v45 }
 0x3e8   :  { %3408 = vmatpush3.bf16.msra.mxu1 %v3770_v45 }
 0x3e9   :  { %3410 = vmatprep.subr.bf16.mxu1 %v3788_v52 }
 0x3ec   :  { %3412 = vmatpush3.bf16.msra.mxu1 %v3788_v52 }
 0x3ed   :  { %3414 = vmatprep.subr.bf16.mxu1 %v3413_v14 }
 0x3ef   :  { %2988 = vmatmul.mubr.f32.vlgmr.msra.gmra.mrb[12].mxu1 %v2325_v17 }
 0x3f0   :  { %2990 = vmatprep.mubr.f32.mxu1 %v2326_v18  ;;  %3416 = vmatpush3.bf16.msra.mxu1 %v3413_v14 }
 0x3f1   :  { %3418 = vmatprep.subr.bf16.mxu1 %v3417_v19 }
 0x3f3   :  { %2991 = vmatmul.mubr.f32.gmra.mrb[14].mxu1 %v2327_v20 }
 0x3f4   :  { %3420 = vmatpush3.bf16.msra.mxu1 %v3417_v19 }
 0x3f5   :  { %3454 = vmatprep.subr.bf16.mxu1 %v3453_v23 }
 0x4c2   :  { %v2989_v41 = vpop.f32.mrb[12].mxu1 }
 0x4c3   :  { %v1299_v43 = vpop.f32.mrb[13].mxu1 }
 0x4c4   :  { %3001 = vmatprep.mubr.msk.f32.mxu1 %vm445_vm2, %v1299_v43 }
 0x4c5   :  { %3002 = vmatmul.mubr.msk.f32.vlgmr.msra.gmra.mrb[4].mxu1 %vm445_vm2, %v2989_v41 }
 0x4c6   :  { %3456 = vmatpush3.bf16.msra.mxu1 %v3453_v23  ;;  %v2992_v48 = vpop.f32.mrb[14].mxu1 }
 0x4c7   :  { %v1309_v49 = vpop.f32.mrb[15].mxu1  ;;  %3458 = vmatprep.subr.bf16.mxu1 %v3457_v44 }
 0x4c8   :  { %3004 = vmatprep.mubr.msk.f32.mxu1 %vm445_vm2, %v1309_v49 }
 0x4c9   :  { %3005 = vmatmul.mubr.msk.f32.gmra.mrb[6].mxu1 %vm445_vm2, %v2992_v48 }
 0x4ca   :  { %3460 = vmatpush3.bf16.msra.mxu1 %v3457_v44  ;;  %3053 = vmatprep.mubr.msk.f32.mxu1 %vm445_vm2, %v4007_v0 }
 0x4cb   :  { %3494 = vmatprep.subr.bf16.mxu1 %v3493_v50 }
 0x4cd   :  { %3054 = vmatmul.mubr.msk.f32.vlgmr.msra.gmra.mrb[4].mxu1 %vm445_vm2, %v4005_v63 }
 0x4ce   :  { %3496 = vmatpush3.bf16.msra.mxu1 %v3493_v50  ;;  %3056 = vmatprep.mubr.msk.f32.mxu1 %vm445_vm2, %v1505_v25 }
 0x4cf   :  { %3498 = vmatprep.subr.bf16.mxu1 %v3497_v54 }
 0x4d1   :  { %3057 = vmatmul.mubr.msk.f32.gmra.mrb[6].mxu1 %vm445_vm2, %v3044_v24 }
 0x4d2   :  { %3500 = vmatpush3.bf16.msra.mxu1 %v3497_v54  ;;  %3105 = vmatprep.mubr.msk.f32.mxu1 %vm445_vm2, %v1691_v34 }
 0x4d3   :  { %3502 = vmatprep.subr.bf16.mxu1 %v3734_v27 }
 0x4d5   :  { %3106 = vmatmul.mubr.msk.f32.vlgmr.msra.gmra.mrb[4].mxu1 %vm445_vm2, %v3093_v26 }
 0x4d6   :  { %3504 = vmatpush3.bf16.msra.mxu1 %v3734_v27  ;;  %3108 = vmatprep.mubr.msk.f32.mxu1 %vm445_vm2, %v1701_v37  ;;  %v2361_v27 = vld [vmem:[%s4212_s2 + $0x108] sm:$0xff] }
 0x4d7   :  { %3506 = vmatprep.subr.bf16.mxu1 %v3740_v30 }
 0x4d9   :  { %3109 = vmatmul.mubr.msk.f32.gmra.mrb[6].mxu1 %vm445_vm2, %v3096_v35  ;;  %v2379_v35 = vld [vmem:[%s4218_s8] ss:$0 sm:$0xff] }
 0x4da   :  { %3508 = vmatpush3.bf16.msra.mxu1 %v3740_v30  ;;  %3143 = vmatprep.mubr.f32.mxu1 %v2360_v55  ;;  %v2362_v30 = vld [vmem:[%s4212_s2 + $0x110] sm:$0xff] }
 0x4db   :  { %3510 = vmatprep.subr.bf16.mxu1 %v3746_v33 }
 0x4de   :  { %3512 = vmatpush3.bf16.msra.mxu1 %v3746_v33  ;;  %v2363_v33 = vld [vmem:[%s4212_s2 + $0x118] sm:$0xff] }
 0x4df   :  { %3514 = vmatprep.subr.bf16.mxu1 %v3752_v36 }
 0x4e2   :  { %3516 = vmatpush3.bf16.msra.mxu1 %v3752_v36  ;;  %v2364_v36 = vld [vmem:[%s4213_s3 + $0x100] sm:$0xff] }
 0x4e3   :  { %3518 = vmatprep.subr.bf16.mxu1 %v3758_v39 }
 0x4e6   :  { %3520 = vmatpush3.bf16.msra.mxu1 %v3758_v39  ;;  %v2365_v39 = vld [vmem:[%s4213_s3 + $0x108] sm:$0xff] }
 0x4e7   :  { %3522 = vmatprep.subr.bf16.mxu1 %v3764_v42 }
 0x4ea   :  { %3524 = vmatpush3.bf16.msra.mxu1 %v3764_v42  ;;  %v2366_v42 = vld [vmem:[%s4213_s3 + $0x110] sm:$0xff] }
 0x4eb   :  { %3526 = vmatprep.subr.bf16.mxu1 %v3770_v45 }
 0x4ee   :  { %3528 = vmatpush3.bf16.msra.mxu1 %v3770_v45  ;;  %v3533_v45 = vpack.c.bf16 %v2365_v39, %v2364_v36 }
 0x4ef   :  { %3530 = vmatprep.subr.bf16.mxu1 %v3788_v52 }
 0x4f0   :  { %3534 = vmatprep.subr.bf16.mxu0 %v3533_v45 }
 0x4f1   :  { %3536 = vmatpush3.bf16.msra.mxu0 %v3533_v45 }
 0x4f2   :  { %3532 = vmatpush3.bf16.msra.mxu1 %v3788_v52  ;;  %v2367_v52 = vld [vmem:[%s4213_s3 + $0x118] sm:$0xff] }
 0x4f3   :  { %v3537_v56 = vpack.c.bf16 %v2367_v52, %v2366_v42  ;;  %3545 = vmatprep.subr.bf16.mxu1 %v3533_v45 }
 0x4f5   :  { %3144 = vmatmul.mubr.f32.vlgmr.msra.gmra.mrb[16].mxu1 %v2361_v27  ;;  %3538 = vmatprep.subr.bf16.mxu0 %v3537_v56 }
 0x4f6   :  { %3146 = vmatprep.mubr.f32.mxu1 %v2362_v30  ;;  %3547 = vmatpush3.bf16.msra.mxu1 %v3533_v45 }
 0x4f7   :  { %3546 = vmatprep.subr.bf16.mxu1 %v3537_v56  ;;  %3540 = vmatpush3.bf16.msra.mxu0 %v3537_v56 }
 0x4f9   :  { %3147 = vmatmul.mubr.f32.gmra.mrb[18].mxu1 %v2363_v33 }
 0x4fa   :  { %3548 = vmatpush3.bf16.msra.mxu1 %v3537_v56 }
 0x5a8   :  { %v3107_v57 = vpop.f32.mrb[4].mxu1 }
 0x5a9   :  { %v3549_v58 = vadd.f32 %v3107_v57, %v3939_v28  ;;  %v1793_v59 = vpop.f32.mrb[5].mxu1  ;;  %v2043_v28 = vld [vmem:[%s4214_s6 + $0x8] sm:$0xff] }
 0x5aa   :  { %v3551_v60 = vadd.f32 %v1793_v59, %v3941_v29  ;;  %v3541_v29 = vpack.c.bf16 %v2043_v28, %v2042_v1 }
 0x5ac   :  { %3542 = vmatprep.subr.bf16.mxu0 %v3541_v29 }
 0x5c8   :  { %v3145_v61 = vpop.f32.mrb[16].mxu1 }
 0x5c9   :  { %v1887_v62 = vpop.f32.mrb[17].mxu1 }
 0x5ca   :  { %3157 = vmatprep.mubr.msk.f32.mxu0 %vm445_vm2, %v1887_v62 }
 0x5cb   :  { %3158 = vmatmul.mubr.msk.f32.vlgmr.msra.gmra.mrb[40].mxu0 %vm445_vm2, %v3145_v61 }
 0x5cc   :  { %v3148_v63 = vpop.f32.mrb[18].mxu1  ;;  %3544 = vmatpush3.bf16.msra.mxu0 %v3541_v29 }
 0x5cd   :  { %v1897_v0 = vpop.f32.mrb[19].mxu1 }
 0x5ce   :  { %3160 = vmatprep.mubr.msk.f32.mxu1 %vm445_vm2, %v1897_v0 }
 0x5cf   :  { %3161 = vmatmul.mubr.msk.f32.vlgmr.msra.gmra.mrb[6].mxu1 %vm445_vm2, %v3148_v63 }
 0x69e   :  { %v3159_v2 = vpop.f32.mrb[40].mxu0 }
 0x69f   :  { %v3550_v4 = vadd.f32 %v3549_v58, %v3159_v2  ;;  %v1989_v5 = vpop.f32.mrb[41].mxu0 }
 0x6a0   :  { %v3552_v7 = vadd.f32 %v3551_v60, %v1989_v5 }
 0x6a1   :  { %v2020_v8 = vmul.f32 %v3550_v4, %v2372_v3 }
 0x6a2   :  { %v2019_v9 = vmul.f32 %v3552_v7, %v2372_v3  ;;  %v3162_v10 = vpop.f32.mrb[6].mxu1 }
 0x6a3   :  { %v2031_v11 = vadd.f32 %v2373_v6, %v2020_v8  ;;  %v3553_v12 = vadd.f32 %v3162_v10, %v3943_v31  ;;  %v1999_v13 = vpop.f32.mrb[7].mxu1 }
 0x6a4   :  { %v2030_v14 = vadd.f32 %v2373_v6, %v2019_v9  ;;  %v3554_v15 = vadd.f32 %v1999_v13, %v3945_v32  ;;  %v2378_v32 = vld [vmem:[%s4217_s7] ss:$0 sm:$0xff] }
 0x6a5   :  { %v2035_v16 = vmul.f32 0.01, %v2031_v11  ;;  %v2022_v17 = vmul.f32 %v3553_v12, %v2372_v3 }
 0x6a6   :  { %v2034_v18 = vmul.f32 0.01, %v2030_v14  ;;  %v2021_v19 = vmul.f32 %v3554_v15, %v2372_v3 }
 0x6a7   :  { %v2033_v20 = vadd.f32 %v2373_v6, %v2022_v17  ;;  %v2039_v23 = vmax.f32 %v2031_v11, %v2035_v16 }
 0x6a8   :  { %v2038_v21 = vmax.f32 %v2030_v14, %v2034_v18  ;;  %v2032_v22 = vadd.f32 %v2373_v6, %v2021_v19 }
 0x6a9   :  { %v2037_v24 = vmul.f32 0.01, %v2033_v20 }
 0x6aa   :  { %v2036_v25 = vmul.f32 0.01, %v2032_v22  ;;  %3167 = vmatprep.mubr.msk.f32.mxu0 %vm2044_vm3, %v2038_v21 }
 0x6ab   :  { %3168 = vmatmul.mubr.msk.f32.vlgmr.msra.gmra.mrb[42].mxu0 %vm2044_vm3, %v2039_v23  ;;  %v2041_v26 = vmax.f32 %v2033_v20, %v2037_v24  ;;  %v2380_v23 = vld [vmem:[%s4219_s9] ss:$0 sm:$0xff] }
 0x6ac   :  { %v2040_v31 = vmax.f32 %v2032_v22, %v2036_v25  ;;  %v2381_v25 = vld [vmem:[%s4220_s10] ss:$0 sm:$0xff] }
 0x6ae   :  { %3170 = vmatprep.mubr.msk.f32.mxu0 %vm2044_vm3, %v2040_v31 }
 0x6af   :  { %3171 = vmatmul.mubr.msk.f32.gmra.mrb[44].mxu0 %vm2044_vm3, %v2041_v26 }
 0x77e   :  { %v3169_v34 = vpop.f32.mrb[42].mxu0 }
 0x77f   :  { %v2150_v37 = vmul.f32 %v3169_v34, %v2378_v32  ;;  %v2123_v38 = vpop.f32.mrb[43].mxu0 }
 0x780   :  { %v2149_v40 = vmul.f32 %v2378_v32, %v2123_v38 }
 0x781   :  { %v2161_v41 = vadd.f32 %v2379_v35, %v2150_v37 }
 0x782   :  { %v2160_v43 = vadd.f32 %v2379_v35, %v2149_v40  ;;  %v3172_v44 = vpop.f32.mrb[44].mxu0 }
 0x783   :  { %v2152_v46 = vmul.f32 %v3172_v44, %v2378_v32  ;;  %v2133_v47 = vpop.f32.mrb[45].mxu0  ;;  %v2165_v50 = vmul.f32 0.01, %v2161_v41 }
 0x784   :  { %v2151_v48 = vmul.f32 %v2378_v32, %v2133_v47  ;;  %v2164_v49 = vmul.f32 0.01, %v2160_v43 }
 0x785   :  { %v2163_v51 = vadd.f32 %v2379_v35, %v2152_v46  ;;  %v2169_v27 = vmax.f32 %v2161_v41, %v2165_v50 }
 0x786   :  { %v2162_v53 = vadd.f32 %v2379_v35, %v2151_v48  ;;  %v2168_v54 = vmax.f32 %v2160_v43, %v2164_v49 }
 0x787   :  { %v2167_v33 = vmul.f32 0.01, %v2163_v51  ;;  %v2175_v39 = vsel %vm2044_vm3, %v2169_v27, 0.0 }
 0x788   :  { %v2172_v55 = vsel %vm2044_vm3, %v2168_v54, 0.0  ;;  %v2166_v30 = vmul.f32 0.01, %v2162_v53 }
 0x789   :  { %2173 = vadd.xlane.f32.xlu0 %v2172_v55  ;;  %v2171_v45 = vmax.f32 %v2163_v51, %v2167_v33 }
 0x78a   :  { %v2170_v36 = vmax.f32 %v2162_v53, %v2166_v30 }
 0x78b   :  { %v2181_v52 = vsel %vm2044_vm3, %v2171_v45, 0.0 }
 0x78c   :  { %v2178_v42 = vsel %vm2044_vm3, %v2170_v36, 0.0 }
 0x78d   :  { %2176 = vadd.xlane.f32.xlu0 %v2175_v39  ;;  %2179 = vadd.xlane.f32.xlu1 %v2178_v42 }
 0x791   :  { %2182 = vadd.xlane.f32.xlu1 %v2181_v52 }
 0x816   :  { %v2174_v56 = vpop.xlane.xlu0 %2173 }
 0x817   :  { %v2185_v57 = vmul.f32 0.0625, %v2174_v56 }
 0x819   :  { %v2189_v58 = vsub.f32 %v2168_v54, %v2185_v57 }
 0x81a   :  { %v2177_v59 = vpop.xlane.xlu0 %2176  ;;  %v2180_v60 = vpop.xlane.xlu1 %2179 }
 0x81b   :  { %v2186_v61 = vmul.f32 0.0625, %v2177_v59  ;;  %v2187_v62 = vmul.f32 0.0625, %v2180_v60  ;;  %v2193_v63 = vmul.f32 %v2189_v58, %v2189_v58 }
 0x81d   :  { %v2190_v0 = vsub.f32 %v2169_v27, %v2186_v61  ;;  %v2191_v1 = vsub.f32 %v2170_v36, %v2187_v62  ;;  %v2197_v28 = vsel %vm2044_vm3, %v2193_v63, 0.0 }
 0x81e   :  { %2198 = vadd.xlane.f32.xlu0 %v2197_v28  ;;  %v2183_v29 = vpop.xlane.xlu1 %2182 }
 0x81f   :  { %v2188_v2 = vmul.f32 0.0625, %v2183_v29  ;;  %v2194_v3 = vmul.f32 %v2190_v0, %v2190_v0  ;;  %v2195_v4 = vmul.f32 %v2191_v1, %v2191_v1 }
 0x821   :  { %v2192_v5 = vsub.f32 %v2171_v45, %v2188_v2  ;;  %v2200_v6 = vsel %vm2044_vm3, %v2194_v3, 0.0  ;;  %v2203_v7 = vsel %vm2044_vm3, %v2195_v4, 0.0 }
 0x822   :  { %2201 = vadd.xlane.f32.xlu1 %v2200_v6  ;;  %2204 = vadd.xlane.f32.xlu0 %v2203_v7 }
 0x823   :  { %v2196_v8 = vmul.f32 %v2192_v5, %v2192_v5 }
 0x825   :  { %v2206_v9 = vsel %vm2044_vm3, %v2196_v8, 0.0 }
 0x826   :  { %2207 = vadd.xlane.f32.xlu1 %v2206_v9 }
 0x8ab   :  { %v2199_v10 = vpop.xlane.xlu0 %2198 }
 0x8ac   :  { %v2209_v11 = vmul.f32 0.0625, %v2199_v10 }
 0x8ae   :  { %v2213_v12 = vadd.f32 1e-05, %v2209_v11 }
 0x8af   :  { %v2205_v13 = vpop.xlane.xlu0 %2204  ;;  %v2202_v14 = vpop.xlane.xlu1 %2201 }
 0x8b0   :  { %3581 = vrsqrt.f32 %v2213_v12  ;;  %v2211_v15 = vmul.f32 0.0625, %v2205_v13  ;;  %v2210_v16 = vmul.f32 0.0625, %v2202_v14 }
 0x8b2   :  { %v2215_v17 = vadd.f32 1e-05, %v2211_v15  ;;  %v2214_v18 = vadd.f32 1e-05, %v2210_v16 }
 0x8b3   :  { %v2208_v19 = vpop.xlane.xlu1 %2207 }
 0x8b4   :  { %3583 = vrsqrt.f32 %v2215_v17  ;;  %v2212_v20 = vmul.f32 0.0625, %v2208_v19 }
 0x8b5   :  { %3585 = vrsqrt.f32 %v2214_v18 }
 0x8b6   :  { %v2216_v21 = vadd.f32 1e-05, %v2212_v20 }
 0x8b8   :  { %3587 = vrsqrt.f32 %v2216_v21 }
 0x8ba   :  { %v3582_v22 = vpop.eup %3581 }
 0x8bb   :  { %v2221_v24 = vmul.f32 %v3582_v22, %v2189_v58 }
 0x8bd   :  { %v2232_v31 = vmul.f32 %v2380_v23, %v2221_v24 }
 0x8be   :  { %v3584_v26 = vpop.eup %3583 }
 0x8bf   :  { %v3586_v32 = vpop.eup %3585  ;;  %v2243_v34 = vadd.f32 %v2381_v25, %v2232_v31  ;;  %v2223_v35 = vmul.f32 %v3584_v26, %v2191_v1 }
 0x8c0   :  { %v2222_v37 = vmul.f32 %v3586_v32, %v2190_v0 }
 0x8c1   :  { %2247 = vst.msk [vmem:[%s4221_s11] sm:$0xff] %vm2044_vm3, %v2243_v34  ;;  %v2234_v38 = vmul.f32 %v2380_v23, %v2223_v35 }
 0x8c2   :  { %v3588_v40 = vpop.eup %3587  ;;  %v2233_v41 = vmul.f32 %v2380_v23, %v2222_v37 }
 0x8c3   :  { %v2245_v43 = vadd.f32 %v2381_v25, %v2234_v38  ;;  %v2224_v44 = vmul.f32 %v3588_v40, %v2192_v5 }
 0x8c4   :  { %v2244_v46 = vadd.f32 %v2381_v25, %v2233_v41 }
 0x8c5   :  { %2249 = vst.msk [vmem:[%s4221_s11 + $0x10] sm:$0xff] %vm2044_vm3, %v2245_v43  ;;  %v2235_v47 = vmul.f32 %v2380_v23, %v2224_v44 }
 0x8c6   :  { %2248 = vst.msk [vmem:[%s4221_s11 + $0x8] sm:$0xff] %vm2044_vm3, %v2244_v46 }
 0x8c7   :  { %v2246_v48 = vadd.f32 %v2381_v25, %v2235_v47 }
 0x8c9   :  { %2250 = vst.msk [vmem:[%s4221_s11 + $0x18] sm:$0xff] %vm2044_vm3, %v2246_v48 }

</bundles_post_ra>
